<compile_context>
chip_gen: v5e
topology: v5e:2x2
jax: 0.10.0
libtpu: 0.0.40
codegen_flags: <defaults>
</compile_context>

<pallas_src>
import functools

import jax
import jax.numpy as jnp
from jax.experimental import pallas as pl
from jax.experimental.pallas import tpu as pltpu

EMBED_SIZE = 32      # model spec uses 256; scaled down for the small demo
HIDDEN_SIZE = 32     # model spec uses 512
VOCAB_SIZE = 64      # model spec uses 1000
NUM_LAYERS = 1       # matches num_layers=1
LANE = 128
SUBLANE = 8


def _round_up(x, m):
    return (x + m - 1) // m * m


def _lstm_caption_kernel(x_ref, wih_ref, whh_ref, b_ref, wout_ref, bout_ref,
                         out_ref, hall_ref, *, batch, seq_len, hidden):
    """Whole captioning forward in a single kernel invocation.

    x_ref    : (T*Bp, E)   time-major inputs (row = t*Bp + b), batch padded
    wih_ref  : (E, 4H)     input->gates weights (pre-transposed)
    whh_ref  : (H, 4H)     hidden->gates weights (pre-transposed)
    b_ref    : (1, 4H)     b_ih + b_hh combined
    wout_ref : (H, Vp)     output projection, zero-padded to Vp (mult. of 128)
    bout_ref : (1, Vp)     output bias, zero-padded
    out_ref  : (T*Bp, Vp)  logits (row = t*Bp + b), lane-dense
    hall_ref : (T*Bp, H)   VMEM scratch collecting h_t for the batched out-proj
    """
    # Hoisted input projection: ONE (T*Bp, E) @ (E, 4H) matmul (+ bias) for
    # all timesteps; only the recurrent h @ W_hh stays in the serial loop.
    x_proj = (jnp.dot(x_ref[...], wih_ref[...],
                      preferred_element_type=jnp.float32)
              + b_ref[...])                                     # (T*Bp, 4H)

    whh = whh_ref[...]                                          # (H, 4H)
    h = jnp.zeros((batch, hidden), jnp.float32)
    c = jnp.zeros((batch, hidden), jnp.float32)

    # Fully-unrolled static time loop (T is a small compile-time constant):
    # all slices are (8, 128)-aligned, the whole recurrence is one dependence
    # chain visible to the scheduler, with zero per-step grid overhead.
    for t in range(seq_len):
        gates = x_proj[t * batch:(t + 1) * batch, :] + jnp.dot(
            h, whh, preferred_element_type=jnp.float32)         # (Bp, 4H)
        # One full-width sigmoid + one full-width tanh EUP push per step
        # (gates is exactly one (8, 128) vreg).
        sig = jax.nn.sigmoid(gates)
        tnh = jnp.tanh(gates)
        # PyTorch LSTM gate order: i, f, g, o
        i_g = sig[:, 0 * hidden:1 * hidden]
        f_g = sig[:, 1 * hidden:2 * hidden]
        g_g = tnh[:, 2 * hidden:3 * hidden]
        o_g = sig[:, 3 * hidden:4 * hidden]
        c = f_g * c + i_g * g_g
        h = o_g * jnp.tanh(c)
        hall_ref[t * batch:(t + 1) * batch, :] = h              # aligned store

    # Hoisted output projection: ONE (T*Bp, H) @ (H, Vp) matmul; Vp is a
    # multiple of 128 so the store is a full-width unmasked vst.
    out_ref[...] = (jnp.dot(hall_ref[...], wout_ref[...],
                            preferred_element_type=jnp.float32)
                    + bout_ref[...]).astype(out_ref.dtype)


@jax.jit
def captioning_forward(params, features, captions):
    """Forward pass of CaptioningModel.

    features : (B, E) float32   (already squeezed, like the PyTorch code)
    captions : (B, L) int32
    returns  : (B, L, V) float32  (T = L: 1 image step + L-1 token steps)
    """
    emb_table = params["embedding"]          # (V, E)
    w_ih_t = params["w_ih_t"]                # (E, 4H)
    w_hh_t = params["w_hh_t"]                # (H, 4H)
    b_gates = params["b_gates"]              # (1, 4H)
    w_out_p = params["w_out_p"]              # (H, Vp)  zero-padded cols
    b_out_p = params["b_out_p"]              # (1, Vp)  zero-padded

    B, E = features.shape
    L = captions.shape[1]
    T = L
    H = w_hh_t.shape[0]
    Vp = w_out_p.shape[1]
    V = params["w_out_t"].shape[1]
    Bp = _round_up(B, SUBLANE)               # sublane-aligned batch

    # Glue (all fused into this single jit around the kernel):
    # embedding gather + image-feature concat, flattened time-major, with the
    # batch zero-padded to Bp so every in-kernel tile is (8, 128)-aligned.
    # TODO(synk): embedding gather stays in the jitted wrapper (jnp.take); an
    # in-kernel SMEM-indexed gather is possible but adds lowering risk here.
    captions_in = captions[:, :-1]                           # (B, L-1)
    emb_tm = jnp.take(emb_table, captions_in.T, axis=0)      # (T-1, B, E)
    inputs_tm = jnp.concatenate([features[None, :, :], emb_tm], axis=0)
    inputs_tm = jnp.pad(inputs_tm, ((0, 0), (0, Bp - B), (0, 0)))
    x_all = inputs_tm.reshape(T * Bp, E)                     # row = t*Bp + b

    kernel = functools.partial(_lstm_caption_kernel,
                               batch=Bp, seq_len=T, hidden=H)

    out_flat = pl.pallas_call(
        kernel,
        out_shape=jax.ShapeDtypeStruct((T * Bp, Vp), jnp.float32),
        grid_spec=pltpu.PrefetchScalarGridSpec(
            num_scalar_prefetch=0,
            grid=(1,),                                        # single invocation
            in_specs=[
                pl.BlockSpec((T * Bp, E), lambda i: (0, 0)),  # x (all steps)
                pl.BlockSpec((E, 4 * H), lambda i: (0, 0)),   # W_ih^T
                pl.BlockSpec((H, 4 * H), lambda i: (0, 0)),   # W_hh^T
                pl.BlockSpec((1, 4 * H), lambda i: (0, 0)),   # b_gates
                pl.BlockSpec((H, Vp), lambda i: (0, 0)),      # W_out^T (padded)
                pl.BlockSpec((1, Vp), lambda i: (0, 0)),      # b_out (padded)
            ],
            out_specs=pl.BlockSpec((T * Bp, Vp), lambda i: (0, 0)),
            scratch_shapes=[pltpu.VMEM((T * Bp, H), jnp.float32)],  # h history
        ),
        compiler_params=pltpu.CompilerParams(
            dimension_semantics=("arbitrary",)),   # recurrence: keep sequential
    )(x_all, w_ih_t, w_hh_t, b_gates, w_out_p, b_out_p)

    # (T*Bp, Vp) -> (B, T, V): slice padding, tiny reshape/transpose, fused.
    return jnp.transpose(out_flat.reshape(T, Bp, Vp)[:, :B, :V], (1, 0, 2))


def init_params(key, embed_size, hidden_size, vocab_size):
    ks = jax.random.split(key, 7)
    s_ih = 1.0 / jnp.sqrt(embed_size)
    s_h = 1.0 / jnp.sqrt(hidden_size)
    emb = jax.random.normal(ks[0], (vocab_size, embed_size), jnp.float32)
    w_ih = jax.random.uniform(ks[1], (4 * hidden_size, embed_size),
                              jnp.float32, -s_ih, s_ih)
    w_hh = jax.random.uniform(ks[2], (4 * hidden_size, hidden_size),
                              jnp.float32, -s_h, s_h)
    b_ih = jax.random.uniform(ks[3], (4 * hidden_size,), jnp.float32, -s_h, s_h)
    b_hh = jax.random.uniform(ks[4], (4 * hidden_size,), jnp.float32, -s_h, s_h)
    w_out = jax.random.uniform(ks[5], (vocab_size, hidden_size),
                               jnp.float32, -s_h, s_h)
    b_out = jax.random.uniform(ks[6], (vocab_size,), jnp.float32, -s_h, s_h)

    w_out_t = w_out.T                                   # (H, V)
    vp = _round_up(vocab_size, LANE)                    # lane-dense output
    w_out_p = jnp.zeros((hidden_size, vp), jnp.float32).at[:, :vocab_size].set(w_out_t)
    b_out_p = jnp.zeros((1, vp), jnp.float32).at[:, :vocab_size].set(b_out)

    return {
        "embedding": emb,
        "w_ih_t": w_ih.T,                       # (E, 4H)
        "w_hh_t": w_hh.T,                       # (H, 4H)
        "b_gates": (b_ih + b_hh)[None, :],      # (1, 4H)
        "w_out_t": w_out_t,                     # (H, V)   (reference / slicing)
        "b_out": b_out[None, :],                # (1, V)
        "w_out_p": w_out_p,                     # (H, Vp)  (kernel, padded)
        "b_out_p": b_out_p,                     # (1, Vp)
    }


def _reference_forward(params, features, captions):
    """Pure-JAX reference (lax.scan LSTM) for validation."""
    emb = jnp.take(params["embedding"], captions[:, :-1], axis=0)
    inputs = jnp.concatenate([features[:, None, :], emb], axis=1)
    B = inputs.shape[0]
    H = params["w_hh_t"].shape[0]

    def step(carry, x_t):
        h, c = carry
        gates = x_t @ params["w_ih_t"] + h @ params["w_hh_t"] + params["b_gates"]
        i = jax.nn.sigmoid(gates[:, 0 * H:1 * H])
        f = jax.nn.sigmoid(gates[:, 1 * H:2 * H])
        g = jnp.tanh(gates[:, 2 * H:3 * H])
        o = jax.nn.sigmoid(gates[:, 3 * H:4 * H])
        c = f * c + i * g
        h = o * jnp.tanh(c)
        return (h, c), h

    h0 = jnp.zeros((B, H), jnp.float32)
    (_, _), hs = jax.lax.scan(step, (h0, h0), jnp.transpose(inputs, (1, 0, 2)))
    out = hs @ params["w_out_t"] + params["b_out"]
    return jnp.transpose(out, (1, 0, 2))


if __name__ == "__main__":
    key = jax.random.PRNGKey(0)
    k_param, k_feat, k_cap = jax.random.split(key, 3)

    B, L = 2, 8                       # batch, caption length (seq)
    params = init_params(k_param, EMBED_SIZE, HIDDEN_SIZE, VOCAB_SIZE)
    features = jax.random.normal(k_feat, (B, EMBED_SIZE), jnp.float32)
    captions = jax.random.randint(k_cap, (B, L), 0, VOCAB_SIZE, jnp.int32)

    out = captioning_forward(params, features, captions)
    out = jax.block_until_ready(out)
    assert out.shape == (B, L, VOCAB_SIZE), out.shape

    ref = jax.block_until_ready(_reference_forward(params, features, captions))
    assert jnp.allclose(out, ref, atol=2e-4, rtol=2e-4), \
        float(jnp.max(jnp.abs(out - ref)))

    print("KERNEL_OK")
</pallas_src>

<mosaic_0001>
module attributes {stable_mosaic.version = 11 : i64} {
  func.func @_lstm_caption_kernel(%arg0: i32, %arg1: memref<64x32xf32, #tpu.memory_space<vmem>>, %arg2: memref<32x128xf32, #tpu.memory_space<vmem>>, %arg3: memref<32x128xf32, #tpu.memory_space<vmem>>, %arg4: memref<1x128xf32, #tpu.memory_space<vmem>>, %arg5: memref<32x128xf32, #tpu.memory_space<vmem>>, %arg6: memref<1x128xf32, #tpu.memory_space<vmem>>, %arg7: memref<64x128xf32, #tpu.memory_space<vmem>>, %arg8: memref<64x32xf32, #tpu.memory_space<vmem>>) attributes {dimension_semantics = [#tpu.dimension_semantics<arbitrary>], iteration_bounds = array<i64: 1>, scalar_prefetch = 0 : i64, scratch_operands = 1 : i64, tpu.core_type = #tpu.core_type<tc>, window_params = [{pipeline_mode = #tpu.pipeline_mode<synchronous>, transform_indices = @transform_0, window_bounds = array<i64: 64, 32>}, {pipeline_mode = #tpu.pipeline_mode<synchronous>, transform_indices = @transform_1, window_bounds = array<i64: 32, 128>}, {pipeline_mode = #tpu.pipeline_mode<synchronous>, transform_indices = @transform_2, window_bounds = array<i64: 32, 128>}, {pipeline_mode = #tpu.pipeline_mode<synchronous>, transform_indices = @transform_3, window_bounds = array<i64: 1, 128>}, {pipeline_mode = #tpu.pipeline_mode<synchronous>, transform_indices = @transform_4, window_bounds = array<i64: 32, 128>}, {pipeline_mode = #tpu.pipeline_mode<synchronous>, transform_indices = @transform_5, window_bounds = array<i64: 1, 128>}, {pipeline_mode = #tpu.pipeline_mode<synchronous>, transform_indices = @transform_6, window_bounds = array<i64: 64, 128>}]} {
    %c0 = arith.constant 0 : index
    %c0_0 = arith.constant 0 : index
    %0 = vector.load %arg1[%c0, %c0_0] : memref<64x32xf32, #tpu.memory_space<vmem>>, vector<64x32xf32>
    %c0_1 = arith.constant 0 : index
    %c0_2 = arith.constant 0 : index
    %1 = vector.load %arg2[%c0_1, %c0_2] : memref<32x128xf32, #tpu.memory_space<vmem>>, vector<32x128xf32>
    %cst = arith.constant dense<0.000000e+00> : vector<64x128xf32>
    %2 = tpu.matmul %0, %1, %cst {dimension_numbers = #tpu.dot_dimension_numbers<[1], [0], [0], [1], [0, 0, 1, 1], [], []>} : vector<64x32xf32>, vector<32x128xf32>, vector<64x128xf32> -> vector<64x128xf32>
    %c0_3 = arith.constant 0 : index
    %c0_4 = arith.constant 0 : index
    %3 = vector.load %arg4[%c0_3, %c0_4] : memref<1x128xf32, #tpu.memory_space<vmem>>, vector<1x128xf32>
    %4 = vector.broadcast %3 : vector<1x128xf32> to vector<64x128xf32>
    %5 = arith.addf %2, %4 : vector<64x128xf32>
    %c0_5 = arith.constant 0 : index
    %c0_6 = arith.constant 0 : index
    %6 = vector.load %arg3[%c0_5, %c0_6] : memref<32x128xf32, #tpu.memory_space<vmem>>, vector<32x128xf32>
    %cst_7 = arith.constant 0.000000e+00 : f32
    %7 = vector.broadcast %cst_7 : f32 to vector<8x32xf32>
    %cst_8 = arith.constant 0.000000e+00 : f32
    %8 = vector.broadcast %cst_8 : f32 to vector<8x32xf32>
    %9 = vector.extract_strided_slice %5 {offsets = [0, 0], sizes = [8, 128], strides = [1, 1]} : vector<64x128xf32> to vector<8x128xf32>
    %cst_9 = arith.constant dense<0.000000e+00> : vector<8x128xf32>
    %10 = tpu.matmul %7, %6, %cst_9 {dimension_numbers = #tpu.dot_dimension_numbers<[1], [0], [0], [1], [0, 0, 1, 1], [], []>} : vector<8x32xf32>, vector<32x128xf32>, vector<8x128xf32> -> vector<8x128xf32>
    %11 = arith.addf %9, %10 : vector<8x128xf32>
    %12 = arith.negf %11 : vector<8x128xf32>
    %13 = math.exp %12 : vector<8x128xf32>
    %cst_10 = arith.constant 1.000000e+00 : f32
    %14 = vector.broadcast %cst_10 : f32 to vector<8x128xf32>
    %15 = arith.addf %14, %13 : vector<8x128xf32>
    %16 = arith.divf %14, %15 : vector<8x128xf32>
    %17 = math.tanh %11 : vector<8x128xf32>
    %18 = vector.extract_strided_slice %16 {offsets = [0, 0], sizes = [8, 32], strides = [1, 1]} : vector<8x128xf32> to vector<8x32xf32>
    %19 = vector.extract_strided_slice %16 {offsets = [0, 32], sizes = [8, 32], strides = [1, 1]} : vector<8x128xf32> to vector<8x32xf32>
    %20 = vector.extract_strided_slice %17 {offsets = [0, 64], sizes = [8, 32], strides = [1, 1]} : vector<8x128xf32> to vector<8x32xf32>
    %21 = vector.extract_strided_slice %16 {offsets = [0, 96], sizes = [8, 32], strides = [1, 1]} : vector<8x128xf32> to vector<8x32xf32>
    %22 = arith.mulf %19, %8 : vector<8x32xf32>
    %23 = arith.mulf %18, %20 : vector<8x32xf32>
    %24 = arith.addf %22, %23 : vector<8x32xf32>
    %25 = math.tanh %24 : vector<8x32xf32>
    %26 = arith.mulf %21, %25 : vector<8x32xf32>
    %c0_11 = arith.constant 0 : index
    %c0_12 = arith.constant 0 : index
    %27 = vector.load %arg8[%c0_11, %c0_12] : memref<64x32xf32, #tpu.memory_space<vmem>>, vector<8x32xf32>
    tpu.vector_store %arg8[%c0_11, %c0_12], %26 {strides = array<i32>} : memref<64x32xf32, #tpu.memory_space<vmem>>, vector<8x32xf32>,
    %28 = vector.extract_strided_slice %5 {offsets = [8, 0], sizes = [8, 128], strides = [1, 1]} : vector<64x128xf32> to vector<8x128xf32>
    %cst_13 = arith.constant dense<0.000000e+00> : vector<8x128xf32>
    %29 = tpu.matmul %26, %6, %cst_13 {dimension_numbers = #tpu.dot_dimension_numbers<[1], [0], [0], [1], [0, 0, 1, 1], [], []>} : vector<8x32xf32>, vector<32x128xf32>, vector<8x128xf32> -> vector<8x128xf32>
    %30 = arith.addf %28, %29 : vector<8x128xf32>
    %31 = arith.negf %30 : vector<8x128xf32>
    %32 = math.exp %31 : vector<8x128xf32>
    %cst_14 = arith.constant 1.000000e+00 : f32
    %33 = vector.broadcast %cst_14 : f32 to vector<8x128xf32>
    %34 = arith.addf %33, %32 : vector<8x128xf32>
    %35 = arith.divf %33, %34 : vector<8x128xf32>
    %36 = math.tanh %30 : vector<8x128xf32>
    %37 = vector.extract_strided_slice %35 {offsets = [0, 0], sizes = [8, 32], strides = [1, 1]} : vector<8x128xf32> to vector<8x32xf32>
    %38 = vector.extract_strided_slice %35 {offsets = [0, 32], sizes = [8, 32], strides = [1, 1]} : vector<8x128xf32> to vector<8x32xf32>
    %39 = vector.extract_strided_slice %36 {offsets = [0, 64], sizes = [8, 32], strides = [1, 1]} : vector<8x128xf32> to vector<8x32xf32>
    %40 = vector.extract_strided_slice %35 {offsets = [0, 96], sizes = [8, 32], strides = [1, 1]} : vector<8x128xf32> to vector<8x32xf32>
    %41 = arith.mulf %38, %24 : vector<8x32xf32>
    %42 = arith.mulf %37, %39 : vector<8x32xf32>
    %43 = arith.addf %41, %42 : vector<8x32xf32>
    %44 = math.tanh %43 : vector<8x32xf32>
    %45 = arith.mulf %40, %44 : vector<8x32xf32>
    %c8 = arith.constant 8 : index
    %c0_15 = arith.constant 0 : index
    %46 = vector.load %arg8[%c8, %c0_15] : memref<64x32xf32, #tpu.memory_space<vmem>>, vector<8x32xf32>
    tpu.vector_store %arg8[%c8, %c0_15], %45 {strides = array<i32>} : memref<64x32xf32, #tpu.memory_space<vmem>>, vector<8x32xf32>,
    %47 = vector.extract_strided_slice %5 {offsets = [16, 0], sizes = [8, 128], strides = [1, 1]} : vector<64x128xf32> to vector<8x128xf32>
    %cst_16 = arith.constant dense<0.000000e+00> : vector<8x128xf32>
    %48 = tpu.matmul %45, %6, %cst_16 {dimension_numbers = #tpu.dot_dimension_numbers<[1], [0], [0], [1], [0, 0, 1, 1], [], []>} : vector<8x32xf32>, vector<32x128xf32>, vector<8x128xf32> -> vector<8x128xf32>
    %49 = arith.addf %47, %48 : vector<8x128xf32>
    %50 = arith.negf %49 : vector<8x128xf32>
    %51 = math.exp %50 : vector<8x128xf32>
    %cst_17 = arith.constant 1.000000e+00 : f32
    %52 = vector.broadcast %cst_17 : f32 to vector<8x128xf32>
    %53 = arith.addf %52, %51 : vector<8x128xf32>
    %54 = arith.divf %52, %53 : vector<8x128xf32>
    %55 = math.tanh %49 : vector<8x128xf32>
    %56 = vector.extract_strided_slice %54 {offsets = [0, 0], sizes = [8, 32], strides = [1, 1]} : vector<8x128xf32> to vector<8x32xf32>
    %57 = vector.extract_strided_slice %54 {offsets = [0, 32], sizes = [8, 32], strides = [1, 1]} : vector<8x128xf32> to vector<8x32xf32>
    %58 = vector.extract_strided_slice %55 {offsets = [0, 64], sizes = [8, 32], strides = [1, 1]} : vector<8x128xf32> to vector<8x32xf32>
    %59 = vector.extract_strided_slice %54 {offsets = [0, 96], sizes = [8, 32], strides = [1, 1]} : vector<8x128xf32> to vector<8x32xf32>
    %60 = arith.mulf %57, %43 : vector<8x32xf32>
    %61 = arith.mulf %56, %58 : vector<8x32xf32>
    %62 = arith.addf %60, %61 : vector<8x32xf32>
    %63 = math.tanh %62 : vector<8x32xf32>
    %64 = arith.mulf %59, %63 : vector<8x32xf32>
    %c16 = arith.constant 16 : index
    %c0_18 = arith.constant 0 : index
    %65 = vector.load %arg8[%c16, %c0_18] : memref<64x32xf32, #tpu.memory_space<vmem>>, vector<8x32xf32>
    tpu.vector_store %arg8[%c16, %c0_18], %64 {strides = array<i32>} : memref<64x32xf32, #tpu.memory_space<vmem>>, vector<8x32xf32>,
    %66 = vector.extract_strided_slice %5 {offsets = [24, 0], sizes = [8, 128], strides = [1, 1]} : vector<64x128xf32> to vector<8x128xf32>
    %cst_19 = arith.constant dense<0.000000e+00> : vector<8x128xf32>
    %67 = tpu.matmul %64, %6, %cst_19 {dimension_numbers = #tpu.dot_dimension_numbers<[1], [0], [0], [1], [0, 0, 1, 1], [], []>} : vector<8x32xf32>, vector<32x128xf32>, vector<8x128xf32> -> vector<8x128xf32>
    %68 = arith.addf %66, %67 : vector<8x128xf32>
    %69 = arith.negf %68 : vector<8x128xf32>
    %70 = math.exp %69 : vector<8x128xf32>
    %cst_20 = arith.constant 1.000000e+00 : f32
    %71 = vector.broadcast %cst_20 : f32 to vector<8x128xf32>
    %72 = arith.addf %71, %70 : vector<8x128xf32>
    %73 = arith.divf %71, %72 : vector<8x128xf32>
    %74 = math.tanh %68 : vector<8x128xf32>
    %75 = vector.extract_strided_slice %73 {offsets = [0, 0], sizes = [8, 32], strides = [1, 1]} : vector<8x128xf32> to vector<8x32xf32>
    %76 = vector.extract_strided_slice %73 {offsets = [0, 32], sizes = [8, 32], strides = [1, 1]} : vector<8x128xf32> to vector<8x32xf32>
    %77 = vector.extract_strided_slice %74 {offsets = [0, 64], sizes = [8, 32], strides = [1, 1]} : vector<8x128xf32> to vector<8x32xf32>
    %78 = vector.extract_strided_slice %73 {offsets = [0, 96], sizes = [8, 32], strides = [1, 1]} : vector<8x128xf32> to vector<8x32xf32>
    %79 = arith.mulf %76, %62 : vector<8x32xf32>
    %80 = arith.mulf %75, %77 : vector<8x32xf32>
    %81 = arith.addf %79, %80 : vector<8x32xf32>
    %82 = math.tanh %81 : vector<8x32xf32>
    %83 = arith.mulf %78, %82 : vector<8x32xf32>
    %c24 = arith.constant 24 : index
    %c0_21 = arith.constant 0 : index
    %84 = vector.load %arg8[%c24, %c0_21] : memref<64x32xf32, #tpu.memory_space<vmem>>, vector<8x32xf32>
    tpu.vector_store %arg8[%c24, %c0_21], %83 {strides = array<i32>} : memref<64x32xf32, #tpu.memory_space<vmem>>, vector<8x32xf32>,
    %85 = vector.extract_strided_slice %5 {offsets = [32, 0], sizes = [8, 128], strides = [1, 1]} : vector<64x128xf32> to vector<8x128xf32>
    %cst_22 = arith.constant dense<0.000000e+00> : vector<8x128xf32>
    %86 = tpu.matmul %83, %6, %cst_22 {dimension_numbers = #tpu.dot_dimension_numbers<[1], [0], [0], [1], [0, 0, 1, 1], [], []>} : vector<8x32xf32>, vector<32x128xf32>, vector<8x128xf32> -> vector<8x128xf32>
    %87 = arith.addf %85, %86 : vector<8x128xf32>
    %88 = arith.negf %87 : vector<8x128xf32>
    %89 = math.exp %88 : vector<8x128xf32>
    %cst_23 = arith.constant 1.000000e+00 : f32
    %90 = vector.broadcast %cst_23 : f32 to vector<8x128xf32>
    %91 = arith.addf %90, %89 : vector<8x128xf32>
    %92 = arith.divf %90, %91 : vector<8x128xf32>
    %93 = math.tanh %87 : vector<8x128xf32>
    %94 = vector.extract_strided_slice %92 {offsets = [0, 0], sizes = [8, 32], strides = [1, 1]} : vector<8x128xf32> to vector<8x32xf32>
    %95 = vector.extract_strided_slice %92 {offsets = [0, 32], sizes = [8, 32], strides = [1, 1]} : vector<8x128xf32> to vector<8x32xf32>
    %96 = vector.extract_strided_slice %93 {offsets = [0, 64], sizes = [8, 32], strides = [1, 1]} : vector<8x128xf32> to vector<8x32xf32>
    %97 = vector.extract_strided_slice %92 {offsets = [0, 96], sizes = [8, 32], strides = [1, 1]} : vector<8x128xf32> to vector<8x32xf32>
    %98 = arith.mulf %95, %81 : vector<8x32xf32>
    %99 = arith.mulf %94, %96 : vector<8x32xf32>
    %100 = arith.addf %98, %99 : vector<8x32xf32>
    %101 = math.tanh %100 : vector<8x32xf32>
    %102 = arith.mulf %97, %101 : vector<8x32xf32>
    %c32 = arith.constant 32 : index
    %c0_24 = arith.constant 0 : index
    %103 = vector.load %arg8[%c32, %c0_24] : memref<64x32xf32, #tpu.memory_space<vmem>>, vector<8x32xf32>
    tpu.vector_store %arg8[%c32, %c0_24], %102 {strides = array<i32>} : memref<64x32xf32, #tpu.memory_space<vmem>>, vector<8x32xf32>,
    %104 = vector.extract_strided_slice %5 {offsets = [40, 0], sizes = [8, 128], strides = [1, 1]} : vector<64x128xf32> to vector<8x128xf32>
    %cst_25 = arith.constant dense<0.000000e+00> : vector<8x128xf32>
    %105 = tpu.matmul %102, %6, %cst_25 {dimension_numbers = #tpu.dot_dimension_numbers<[1], [0], [0], [1], [0, 0, 1, 1], [], []>} : vector<8x32xf32>, vector<32x128xf32>, vector<8x128xf32> -> vector<8x128xf32>
    %106 = arith.addf %104, %105 : vector<8x128xf32>
    %107 = arith.negf %106 : vector<8x128xf32>
    %108 = math.exp %107 : vector<8x128xf32>
    %cst_26 = arith.constant 1.000000e+00 : f32
    %109 = vector.broadcast %cst_26 : f32 to vector<8x128xf32>
    %110 = arith.addf %109, %108 : vector<8x128xf32>
    %111 = arith.divf %109, %110 : vector<8x128xf32>
    %112 = math.tanh %106 : vector<8x128xf32>
    %113 = vector.extract_strided_slice %111 {offsets = [0, 0], sizes = [8, 32], strides = [1, 1]} : vector<8x128xf32> to vector<8x32xf32>
    %114 = vector.extract_strided_slice %111 {offsets = [0, 32], sizes = [8, 32], strides = [1, 1]} : vector<8x128xf32> to vector<8x32xf32>
    %115 = vector.extract_strided_slice %112 {offsets = [0, 64], sizes = [8, 32], strides = [1, 1]} : vector<8x128xf32> to vector<8x32xf32>
    %116 = vector.extract_strided_slice %111 {offsets = [0, 96], sizes = [8, 32], strides = [1, 1]} : vector<8x128xf32> to vector<8x32xf32>
    %117 = arith.mulf %114, %100 : vector<8x32xf32>
    %118 = arith.mulf %113, %115 : vector<8x32xf32>
    %119 = arith.addf %117, %118 : vector<8x32xf32>
    %120 = math.tanh %119 : vector<8x32xf32>
    %121 = arith.mulf %116, %120 : vector<8x32xf32>
    %c40 = arith.constant 40 : index
    %c0_27 = arith.constant 0 : index
    %122 = vector.load %arg8[%c40, %c0_27] : memref<64x32xf32, #tpu.memory_space<vmem>>, vector<8x32xf32>
    tpu.vector_store %arg8[%c40, %c0_27], %121 {strides = array<i32>} : memref<64x32xf32, #tpu.memory_space<vmem>>, vector<8x32xf32>,
    %123 = vector.extract_strided_slice %5 {offsets = [48, 0], sizes = [8, 128], strides = [1, 1]} : vector<64x128xf32> to vector<8x128xf32>
    %cst_28 = arith.constant dense<0.000000e+00> : vector<8x128xf32>
    %124 = tpu.matmul %121, %6, %cst_28 {dimension_numbers = #tpu.dot_dimension_numbers<[1], [0], [0], [1], [0, 0, 1, 1], [], []>} : vector<8x32xf32>, vector<32x128xf32>, vector<8x128xf32> -> vector<8x128xf32>
    %125 = arith.addf %123, %124 : vector<8x128xf32>
    %126 = arith.negf %125 : vector<8x128xf32>
    %127 = math.exp %126 : vector<8x128xf32>
    %cst_29 = arith.constant 1.000000e+00 : f32
    %128 = vector.broadcast %cst_29 : f32 to vector<8x128xf32>
    %129 = arith.addf %128, %127 : vector<8x128xf32>
    %130 = arith.divf %128, %129 : vector<8x128xf32>
    %131 = math.tanh %125 : vector<8x128xf32>
    %132 = vector.extract_strided_slice %130 {offsets = [0, 0], sizes = [8, 32], strides = [1, 1]} : vector<8x128xf32> to vector<8x32xf32>
    %133 = vector.extract_strided_slice %130 {offsets = [0, 32], sizes = [8, 32], strides = [1, 1]} : vector<8x128xf32> to vector<8x32xf32>
    %134 = vector.extract_strided_slice %131 {offsets = [0, 64], sizes = [8, 32], strides = [1, 1]} : vector<8x128xf32> to vector<8x32xf32>
    %135 = vector.extract_strided_slice %130 {offsets = [0, 96], sizes = [8, 32], strides = [1, 1]} : vector<8x128xf32> to vector<8x32xf32>
    %136 = arith.mulf %133, %119 : vector<8x32xf32>
    %137 = arith.mulf %132, %134 : vector<8x32xf32>
    %138 = arith.addf %136, %137 : vector<8x32xf32>
    %139 = math.tanh %138 : vector<8x32xf32>
    %140 = arith.mulf %135, %139 : vector<8x32xf32>
    %c48 = arith.constant 48 : index
    %c0_30 = arith.constant 0 : index
    %141 = vector.load %arg8[%c48, %c0_30] : memref<64x32xf32, #tpu.memory_space<vmem>>, vector<8x32xf32>
    tpu.vector_store %arg8[%c48, %c0_30], %140 {strides = array<i32>} : memref<64x32xf32, #tpu.memory_space<vmem>>, vector<8x32xf32>,
    %142 = vector.extract_strided_slice %5 {offsets = [56, 0], sizes = [8, 128], strides = [1, 1]} : vector<64x128xf32> to vector<8x128xf32>
    %cst_31 = arith.constant dense<0.000000e+00> : vector<8x128xf32>
    %143 = tpu.matmul %140, %6, %cst_31 {dimension_numbers = #tpu.dot_dimension_numbers<[1], [0], [0], [1], [0, 0, 1, 1], [], []>} : vector<8x32xf32>, vector<32x128xf32>, vector<8x128xf32> -> vector<8x128xf32>
    %144 = arith.addf %142, %143 : vector<8x128xf32>
    %145 = arith.negf %144 : vector<8x128xf32>
    %146 = math.exp %145 : vector<8x128xf32>
    %cst_32 = arith.constant 1.000000e+00 : f32
    %147 = vector.broadcast %cst_32 : f32 to vector<8x128xf32>
    %148 = arith.addf %147, %146 : vector<8x128xf32>
    %149 = arith.divf %147, %148 : vector<8x128xf32>
    %150 = math.tanh %144 : vector<8x128xf32>
    %151 = vector.extract_strided_slice %149 {offsets = [0, 0], sizes = [8, 32], strides = [1, 1]} : vector<8x128xf32> to vector<8x32xf32>
    %152 = vector.extract_strided_slice %149 {offsets = [0, 32], sizes = [8, 32], strides = [1, 1]} : vector<8x128xf32> to vector<8x32xf32>
    %153 = vector.extract_strided_slice %150 {offsets = [0, 64], sizes = [8, 32], strides = [1, 1]} : vector<8x128xf32> to vector<8x32xf32>
    %154 = vector.extract_strided_slice %149 {offsets = [0, 96], sizes = [8, 32], strides = [1, 1]} : vector<8x128xf32> to vector<8x32xf32>
    %155 = arith.mulf %152, %138 : vector<8x32xf32>
    %156 = arith.mulf %151, %153 : vector<8x32xf32>
    %157 = arith.addf %155, %156 : vector<8x32xf32>
    %158 = math.tanh %157 : vector<8x32xf32>
    %159 = arith.mulf %154, %158 : vector<8x32xf32>
    %c56 = arith.constant 56 : index
    %c0_33 = arith.constant 0 : index
    %160 = vector.load %arg8[%c56, %c0_33] : memref<64x32xf32, #tpu.memory_space<vmem>>, vector<8x32xf32>
    tpu.vector_store %arg8[%c56, %c0_33], %159 {strides = array<i32>} : memref<64x32xf32, #tpu.memory_space<vmem>>, vector<8x32xf32>,
    %c0_34 = arith.constant 0 : index
    %c0_35 = arith.constant 0 : index
    %161 = vector.load %arg8[%c0_34, %c0_35] : memref<64x32xf32, #tpu.memory_space<vmem>>, vector<64x32xf32>
    %c0_36 = arith.constant 0 : index
    %c0_37 = arith.constant 0 : index
    %162 = vector.load %arg5[%c0_36, %c0_37] : memref<32x128xf32, #tpu.memory_space<vmem>>, vector<32x128xf32>
    %cst_38 = arith.constant dense<0.000000e+00> : vector<64x128xf32>
    %163 = tpu.matmul %161, %162, %cst_38 {dimension_numbers = #tpu.dot_dimension_numbers<[1], [0], [0], [1], [0, 0, 1, 1], [], []>} : vector<64x32xf32>, vector<32x128xf32>, vector<64x128xf32> -> vector<64x128xf32>
    %c0_39 = arith.constant 0 : index
    %c0_40 = arith.constant 0 : index
    %164 = vector.load %arg6[%c0_39, %c0_40] : memref<1x128xf32, #tpu.memory_space<vmem>>, vector<1x128xf32>
    %165 = vector.broadcast %164 : vector<1x128xf32> to vector<64x128xf32>
    %166 = arith.addf %163, %165 : vector<64x128xf32>
    %c0_41 = arith.constant 0 : index
    %c0_42 = arith.constant 0 : index
    %167 = vector.load %arg7[%c0_41, %c0_42] : memref<64x128xf32, #tpu.memory_space<vmem>>, vector<64x128xf32>
    tpu.vector_store %arg7[%c0_41, %c0_42], %166 {strides = array<i32>} : memref<64x128xf32, #tpu.memory_space<vmem>>, vector<64x128xf32>,
    return
  }
  func.func @transform_0(%arg0: i32) -> (i32, i32) {
    %c0_i32 = arith.constant 0 : i32
    %c0_i32_0 = arith.constant 0 : i32
    %c0_i32_1 = arith.constant 0 : i32
    return %c0_i32, %c0_i32_0 : i32, i32
  }
  func.func @transform_1(%arg0: i32) -> (i32, i32) {
    %c0_i32 = arith.constant 0 : i32
    %c0_i32_0 = arith.constant 0 : i32
    %c0_i32_1 = arith.constant 0 : i32
    return %c0_i32, %c0_i32_0 : i32, i32
  }
  func.func @transform_2(%arg0: i32) -> (i32, i32) {
    %c0_i32 = arith.constant 0 : i32
    %c0_i32_0 = arith.constant 0 : i32
    %c0_i32_1 = arith.constant 0 : i32
    return %c0_i32, %c0_i32_0 : i32, i32
  }
  func.func @transform_3(%arg0: i32) -> (i32, i32) {
    %c0_i32 = arith.constant 0 : i32
    %c0_i32_0 = arith.constant 0 : i32
    %c0_i32_1 = arith.constant 0 : i32
    return %c0_i32, %c0_i32_0 : i32, i32
  }
  func.func @transform_4(%arg0: i32) -> (i32, i32) {
    %c0_i32 = arith.constant 0 : i32
    %c0_i32_0 = arith.constant 0 : i32
    %c0_i32_1 = arith.constant 0 : i32
    return %c0_i32, %c0_i32_0 : i32, i32
  }
  func.func @transform_5(%arg0: i32) -> (i32, i32) {
    %c0_i32 = arith.constant 0 : i32
    %c0_i32_0 = arith.constant 0 : i32
    %c0_i32_1 = arith.constant 0 : i32
    return %c0_i32, %c0_i32_0 : i32, i32
  }
  func.func @transform_6(%arg0: i32) -> (i32, i32) {
    %c0_i32 = arith.constant 0 : i32
    %c0_i32_0 = arith.constant 0 : i32
    %c0_i32_1 = arith.constant 0 : i32
    return %c0_i32, %c0_i32_0 : i32, i32
  }
}

</mosaic_0001>

<bundles_post_ra>
// kernel: captioning_forward.1
= control target key start
LH: loop header
LB: loop body
LE: loop exit
PB: predicated region body
PF: predicated region fallthrough
CT: control target
= control target key end

     0   :  { %vm39_vm0 = vcmask 261120   ;;  %v831_v11 = vmov 0.0   ;;  %s832_s19 = smov 64   ;;  %s1092_s1 = inlined_call_operand.vmem [shape: f32[32,128], index: 1, kind: input, shape index: {}]   ;;  %s1093_s2 = inlined_call_operand.vmem [shape: f32[32,128], index: 2, kind: input, shape index: {}]   ;;  %s1094_s0 = inlined_call_operand.vmem [shape: f32[64,32], index: 0, kind: input, shape index: {}]   ;;  %s1095_s3 = inlined_call_operand.vmem [shape: f32[1,128], index: 3, kind: input, shape index: {}]   ;;  %s1096_s4 = inlined_call_operand.vmem [shape: f32[32,128], index: 4, kind: input, shape index: {}]   ;;  %s1097_s5 = inlined_call_operand.vmem [shape: f32[1,128], index: 5, kind: input, shape index: {}]   ;;  %s1098_s6 = inlined_call_operand.vmem [shape: f32[64,128], index: 6, kind: output, shape index: {}]  }
   0x1   :  { %v34_v0 = vld [vmem:[%s1092_s1 + $0x18] sm:$0xff]  ;;  %v33_v1 = vld [vmem:[%s1092_s1 + $0x10] sm:$0xff]  ;;  %v32_v3 = vld [vmem:[%s1092_s1 + $0x8] sm:$0xff] }
   0x2   :  { %754 = vmatpush.msra.mxu2 %v34_v0  ;;  %v878_v2 = vld [vmem:[%s1093_s2 + $0x18] sm:$0xff]  ;;  %76 = vmatpush.msra.mxu0 %v34_v0  ;;  %v888_v4 = vld [vmem:[%s1093_s2 + $0x10] sm:$0xff]  ;;  %v31_v5 = vld [vmem:[%s1092_s1] sm:$0xff] }
   0x3   :  { %254 = vmatpush.msra.mxu3 %v878_v2  ;;  %319 = vmatpush.msra.mxu1 %v878_v2  ;;  %v29_v6 = vld [vmem:[%s1094_s0 + $0x30] sm:$0xff]  ;;  %v901_v7 = vld [vmem:[%s1093_s2 + $0x8] sm:$0xff]  ;;  %v23_v8 = vld [vmem:[%s1094_s0] sm:$0xff] }
   0x4   :  { %755 = vmatpush.msra.mxu2 %v33_v1  ;;  %77 = vmatpush.msra.mxu0 %v33_v1  ;;  %v912_v9 = vld [vmem:[%s1093_s2] sm:$0xff]  ;;  %v30_v10 = vld [vmem:[%s1094_s0 + $0x38] sm:$0xff]  ;;  %v24_v41 = vld [vmem:[%s1094_s0 + $0x8] sm:$0xff] }
   0x5   :  { %255 = vmatpush.msra.mxu3 %v888_v4  ;;  %320 = vmatpush.msra.mxu1 %v888_v4  ;;  %v948_v15 = vld [vmem:[%s1095_s3] ss:$0 sm:$0xff]  ;;  %s833_s3 = smov 32  }
   0x6   :  { %756 = vmatpush.msra.mxu2 %v32_v3  ;;  %78 = vmatpush.msra.mxu0 %v32_v3 }
   0x7   :  { %256 = vmatpush.msra.mxu3 %v901_v7  ;;  %321 = vmatpush.msra.mxu1 %v901_v7 }
   0x8   :  { %757 = vmatpush.msra.mxu2 %v31_v5  ;;  %79 = vmatpush.msra.mxu0 %v31_v5  ;;  %v25_v5 = vld [vmem:[%s1094_s0 + $0x10] sm:$0xff] }
   0x9   :  { %729 = vmatmul.msk.f32.vlgmr.msra.gmra.mxu2 %vm39_vm0, %v29_v6  ;;  %723 = vmatmul.msk.f32.vlgmr.msra.gmra.mxu0 %vm39_vm0, %v23_v8 }
   0xa   :  { %124 = vmatpush.msrb.mxu2 %v878_v2  ;;  %257 = vmatpush.msra.mxu3 %v912_v9 }
   0xb   :  { %322 = vmatpush.msra.mxu1 %v912_v9 }
   0xc   :  { %449 = vmatpush.msrb.mxu3 %v878_v2  ;;  %125 = vmatpush.msrb.mxu2 %v888_v4 }
   0xd   :  { %514 = vmatpush.msrb.mxu1 %v878_v2 }
   0xe   :  { %450 = vmatpush.msrb.mxu3 %v888_v4  ;;  %126 = vmatpush.msrb.mxu2 %v901_v7 }
   0xf   :  { %515 = vmatpush.msrb.mxu1 %v888_v4 }
  0x10   :  { %451 = vmatpush.msrb.mxu3 %v901_v7  ;;  %127 = vmatpush.msrb.mxu2 %v912_v9 }
  0x11   :  { %516 = vmatpush.msrb.mxu1 %v901_v7  ;;  %730 = vmatmul.msk.f32.gmra.mxu2 %vm39_vm0, %v30_v10 }
  0x12   :  { %452 = vmatpush.msrb.mxu3 %v912_v9  ;;  %189 = vmatpush.msra.mxu2 %v878_v2 }
  0x13   :  { %517 = vmatpush.msrb.mxu1 %v912_v9  ;;  %724 = vmatmul.msk.f32.gmra.mxu0 %vm39_vm0, %v24_v41 }
  0x14   :  { %190 = vmatpush.msra.mxu2 %v888_v4 }
  0x16   :  { %191 = vmatpush.msra.mxu2 %v901_v7 }
  0x18   :  { %192 = vmatpush.msra.mxu2 %v912_v9 }
  0x19   :  { %128 = vmatmul.f32.vlgmr.msrb.gmra.mxu2 %v831_v11 }
  0x1a   :  { %384 = vmatpush.msrb.mxu2 %v878_v2 }
  0x1b   :  { %725 = vmatmul.msk.f32.gmra.mxu0 %vm39_vm0, %v25_v5 }
  0x1c   :  { %385 = vmatpush.msrb.mxu2 %v888_v4 }
  0x1e   :  { %386 = vmatpush.msrb.mxu2 %v901_v7 }
  0x20   :  { %387 = vmatpush.msrb.mxu2 %v912_v9 }
  0x86   :  { %v81_v14 = vpop.f32.mrf.mxu0 }
  0x87   :  { %v82_v16 = vadd.f32 %v948_v15, %v81_v14 }
  0x8c   :  { %v941_v12 = vpop.f32.mrf.mxu2 }
  0x90   :  { %v84_v43 = vpop.f32.mrf.mxu0 }
  0x91   :  { %v85_v44 = vadd.f32 %v948_v15, %v84_v43 }
  0x94   :  { %v943_v13 = vpop.f32.mrf.mxu2 }
  0x9c   :  { %v129_v17 = vpop.f32.mrf.mxu2 }
  0x9d   :  { %v132_v18 = vadd.f32 %v129_v17, %v82_v16 }
  0x9f   :  { %767 = vtanh.f32 %v132_v18  ;;  %v731_v20 = vmul.f32 -1.442695, %v132_v18 }
  0xa1   :  { %769 = vpow2.f32 %v731_v20 }
  0xa5   :  { %v768_v19 = vpop.eup %767 }
  0xa6   :  { %155 = vrot.lane.b32.xlu0 %v768_v19, %s832_s19 }
  0xa7   :  { %v770_v21 = vpop.eup %769 }
  0xa8   :  { %v136_v22 = vadd.f32 1.0, %v770_v21 }
  0xaa   :  { %771 = vrcp.f32 %v136_v22  ;;  %v148_v28 = vand.u32 2147483648, %v136_v22  ;;  %vm142_vm2 = vweird.f32 %v136_v22  ;;  %v146_v29 = vand.u32 2147483647, %v136_v22 }
  0xac   :  { %v149_v31 = vor.u32 1.1754944e-38, %v148_v28  ;;  %vm147_vm4 = vcmp.eq.f32.partialorder %v146_v29, 8.507059e+37 }
  0xb0   :  { %v772_v23 = vpop.eup %771 }
  0xb1   :  { %v138_v24 = vmul.f32 %v772_v23, %v136_v22  ;;  %vm143_vm1 = vweird.f32 %v772_v23 }
  0xb2   :  { %vm144_vm3 = vmor %vm142_vm2, %vm143_vm1 }
  0xb3   :  { %v139_v25 = vsub.f32 1.0, %v138_v24 }
  0xb5   :  { %v140_v26 = vmul.f32 %v772_v23, %v139_v25 }
  0xb7   :  { %v141_v27 = vadd.f32 %v772_v23, %v140_v26 }
  0xb9   :  { %v145_v30 = vsel %vm144_vm3, %v772_v23, %v141_v27 }
  0xba   :  { %v150_v33 = vsel %vm147_vm4, %v149_v31, %v145_v30 }
  0xbb   :  { %v153_v35 = vmul.f32 0.0, %v150_v33 }
 0x118   :  { %v156_v32 = vpop.permute.xlu0 %155 }
 0x119   :  { %v158_v34 = vmul.f32 %v156_v32, %v150_v33 }
 0x11b   :  { %160 = vrot.lane.b32.xlu0 %v158_v34, %s833_s3  ;;  %v26_v34 = vld [vmem:[%s1094_s0 + $0x18] sm:$0xff] }
 0x11c   :  { %726 = vmatmul.msk.f32.gmra.mxu0 %vm39_vm0, %v26_v34  ;;  %v639_v34 = vld [vmem:[%s1096_s4 + $0x8] sm:$0xff] }
 0x18d   :  { %v161_v36 = vpop.permute.xlu0 %160 }
 0x18e   :  { %v163_v37 = vadd.f32 %v161_v36, %v153_v35 }
 0x190   :  { %773 = vtanh.f32 %v163_v37 }
 0x196   :  { %v774_v38 = vpop.eup %773 }
 0x197   :  { %166 = vrot.lane.b32.xlu1 %v774_v38, %s832_s19 }
 0x209   :  { %v167_v39 = vpop.permute.xlu1 %166 }
 0x20a   :  { %v169_v40 = vmul.f32 %v167_v39, %v150_v33 }
 0x20c   :  { %171 = vrot.lane.b32.xlu1 %v169_v40, %s833_s3 }
 0x27e   :  { %v172_v42 = vpop.permute.xlu1 %171 }
 0x27f   :  { %174 = vst.msk [vmem:[#allocation2] sm:$0xff] %vm39_vm0, %v172_v42  ;;  %732 = vmatmul.msk.f32.vlgmr.msra.gmra.mxu2 %vm39_vm0, %v172_v42 }
 0x280   :  { %579 = vmatpush.msra.mxu2 %v878_v2 }
 0x282   :  { %580 = vmatpush.msra.mxu2 %v888_v4 }
 0x284   :  { %581 = vmatpush.msra.mxu2 %v901_v7  ;;  %v87_v7 = vpop.f32.mrf.mxu0 }
 0x285   :  { %v88_v8 = vadd.f32 %v948_v15, %v87_v7 }
 0x286   :  { %582 = vmatpush.msra.mxu2 %v912_v9 }
 0x28c   :  { %v90_v38 = vpop.f32.mrf.mxu0 }
 0x28d   :  { %v91_v39 = vadd.f32 %v948_v15, %v90_v38 }
 0x302   :  { %v194_v45 = vpop.f32.mrf.mxu2 }
 0x303   :  { %v197_v46 = vadd.f32 %v194_v45, %v85_v44 }
 0x305   :  { %775 = vtanh.f32 %v197_v46  ;;  %v733_v48 = vmul.f32 -1.442695, %v197_v46 }
 0x307   :  { %777 = vpow2.f32 %v733_v48 }
 0x30b   :  { %v776_v47 = vpop.eup %775 }
 0x30c   :  { %220 = vrot.lane.b32.xlu2 %v776_v47, %s832_s19 }
 0x30d   :  { %v778_v49 = vpop.eup %777 }
 0x30e   :  { %v201_v50 = vadd.f32 1.0, %v778_v49 }
 0x310   :  { %779 = vrcp.f32 %v201_v50  ;;  %v213_v56 = vand.u32 2147483648, %v201_v50  ;;  %vm207_vm6 = vweird.f32 %v201_v50  ;;  %v211_v57 = vand.u32 2147483647, %v201_v50 }
 0x312   :  { %v214_v59 = vor.u32 1.1754944e-38, %v213_v56  ;;  %vm212_vm8 = vcmp.eq.f32.partialorder %v211_v57, 8.507059e+37 }
 0x316   :  { %v780_v51 = vpop.eup %779 }
 0x317   :  { %v203_v52 = vmul.f32 %v780_v51, %v201_v50  ;;  %vm208_vm5 = vweird.f32 %v780_v51 }
 0x318   :  { %vm209_vm7 = vmor %vm207_vm6, %vm208_vm5 }
 0x319   :  { %v204_v53 = vsub.f32 1.0, %v203_v52 }
 0x31b   :  { %v205_v54 = vmul.f32 %v780_v51, %v204_v53 }
 0x31d   :  { %v206_v55 = vadd.f32 %v780_v51, %v205_v54 }
 0x31f   :  { %v210_v58 = vsel %vm209_vm7, %v780_v51, %v206_v55 }
 0x320   :  { %v215_v61 = vsel %vm212_vm8, %v214_v59, %v210_v58 }
 0x321   :  { %v218_v63 = vmul.f32 %v215_v61, %v163_v37 }
 0x366   :  { %v221_v60 = vpop.permute.xlu2 %220 }
 0x367   :  { %v223_v62 = vmul.f32 %v221_v60, %v215_v61 }
 0x369   :  { %225 = vrot.lane.b32.xlu2 %v223_v62, %s833_s3 }
 0x3c3   :  { %v226_v0 = vpop.permute.xlu2 %225 }
 0x3c4   :  { %v228_v1 = vadd.f32 %v226_v0, %v218_v63  ;;  %v27_v0 = vld [vmem:[%s1094_s0 + $0x20] sm:$0xff] }
 0x3c5   :  { %727 = vmatmul.msk.f32.gmra.mxu0 %vm39_vm0, %v27_v0 }
 0x3c6   :  { %781 = vtanh.f32 %v228_v1 }
 0x3cc   :  { %v782_v2 = vpop.eup %781 }
 0x3cd   :  { %231 = vrot.lane.b32.xlu0 %v782_v2, %s832_s19 }
 0x43f   :  { %v232_v3 = vpop.permute.xlu0 %231 }
 0x440   :  { %v234_v4 = vmul.f32 %v232_v3, %v215_v61 }
 0x442   :  { %236 = vrot.lane.b32.xlu1 %v234_v4, %s833_s3  ;;  %v93_v2 = vpop.f32.mrf.mxu0 }
 0x443   :  { %v94_v3 = vadd.f32 %v948_v15, %v93_v2 }
 0x4b4   :  { %v237_v6 = vpop.permute.xlu1 %236 }
 0x4b5   :  { %239 = vst.msk [vmem:[#allocation2 + $0x8] sm:$0xff] %vm39_vm0, %v237_v6  ;;  %734 = vmatmul.msk.f32.vlgmr.msra.gmra.mxu3 %vm39_vm0, %v237_v6 }
 0x538   :  { %v259_v9 = vpop.f32.mrf.mxu3 }
 0x539   :  { %v262_v10 = vadd.f32 %v259_v9, %v88_v8 }
 0x53b   :  { %783 = vtanh.f32 %v262_v10  ;;  %v735_v14 = vmul.f32 -1.442695, %v262_v10 }
 0x53d   :  { %785 = vpow2.f32 %v735_v14 }
 0x541   :  { %v784_v11 = vpop.eup %783 }
 0x542   :  { %285 = vrot.lane.b32.xlu2 %v784_v11, %s832_s19 }
 0x543   :  { %v786_v16 = vpop.eup %785 }
 0x544   :  { %v266_v17 = vadd.f32 1.0, %v786_v16 }
 0x546   :  { %787 = vrcp.f32 %v266_v17  ;;  %v278_v23 = vand.u32 2147483648, %v266_v17  ;;  %vm272_vm10 = vweird.f32 %v266_v17  ;;  %v276_v24 = vand.u32 2147483647, %v266_v17 }
 0x548   :  { %v279_v26 = vor.u32 1.1754944e-38, %v278_v23  ;;  %vm277_vm12 = vcmp.eq.f32.partialorder %v276_v24, 8.507059e+37 }
 0x54c   :  { %v788_v18 = vpop.eup %787 }
 0x54d   :  { %v268_v19 = vmul.f32 %v788_v18, %v266_v17  ;;  %vm273_vm9 = vweird.f32 %v788_v18 }
 0x54e   :  { %vm274_vm11 = vmor %vm272_vm10, %vm273_vm9 }
 0x54f   :  { %v269_v20 = vsub.f32 1.0, %v268_v19 }
 0x551   :  { %v270_v21 = vmul.f32 %v788_v18, %v269_v20 }
 0x553   :  { %v271_v22 = vadd.f32 %v788_v18, %v270_v21 }
 0x555   :  { %v275_v25 = vsel %vm274_vm11, %v788_v18, %v271_v22 }
 0x556   :  { %v280_v28 = vsel %vm277_vm12, %v279_v26, %v275_v25 }
 0x557   :  { %v283_v30 = vmul.f32 %v280_v28, %v228_v1 }
 0x59c   :  { %v286_v27 = vpop.permute.xlu2 %285 }
 0x59d   :  { %v288_v29 = vmul.f32 %v286_v27, %v280_v28 }
 0x59f   :  { %290 = vrot.lane.b32.xlu0 %v288_v29, %s833_s3 }
 0x611   :  { %v291_v31 = vpop.permute.xlu0 %290 }
 0x612   :  { %v293_v32 = vadd.f32 %v291_v31, %v283_v30  ;;  %v641_v31 = vld [vmem:[%s1096_s4 + $0x18] sm:$0xff] }
 0x613   :  { %758 = vmatpush.msra.mxu3 %v641_v31 }
 0x614   :  { %789 = vtanh.f32 %v293_v32 }
 0x61a   :  { %v790_v33 = vpop.eup %789 }
 0x61b   :  { %296 = vrot.lane.b32.xlu1 %v790_v33, %s832_s19  ;;  %v28_v33 = vld [vmem:[%s1094_s0 + $0x28] sm:$0xff] }
 0x61c   :  { %728 = vmatmul.msk.f32.gmra.mxu0 %vm39_vm0, %v28_v33 }
 0x68d   :  { %v297_v35 = vpop.permute.xlu1 %296 }
 0x68e   :  { %v299_v36 = vmul.f32 %v297_v35, %v280_v28  ;;  %v638_v35 = vld [vmem:[%s1096_s4] sm:$0xff] }
 0x690   :  { %301 = vrot.lane.b32.xlu2 %v299_v36, %s833_s3 }
 0x699   :  { %v96_v38 = vpop.f32.mrf.mxu0 }
 0x6ea   :  { %v302_v37 = vpop.permute.xlu2 %301 }
 0x6eb   :  { %304 = vst.msk [vmem:[#allocation2 + $0x10] sm:$0xff] %vm39_vm0, %v302_v37  ;;  %736 = vmatmul.msk.f32.vlgmr.msra.gmra.mxu1 %vm39_vm0, %v302_v37 }
 0x6ec   :  { %682 = vmatpush.msra.mxu1 %v641_v31 }
 0x768   :  { %v324_v40 = vpop.f32.mrf.mxu1 }
 0x769   :  { %v327_v41 = vadd.f32 %v324_v40, %v91_v39  ;;  %v97_v39 = vadd.f32 %v948_v15, %v96_v38 }
 0x76b   :  { %791 = vtanh.f32 %v327_v41  ;;  %v737_v43 = vmul.f32 -1.442695, %v327_v41 }
 0x76d   :  { %793 = vpow2.f32 %v737_v43 }
 0x771   :  { %v792_v42 = vpop.eup %791 }
 0x772   :  { %350 = vrot.lane.b32.xlu0 %v792_v42, %s832_s19  ;;  %v1026_v42 = vld [vmem:[%s1097_s5] ss:$0 sm:$0xff] }
 0x773   :  { %v794_v44 = vpop.eup %793 }
 0x774   :  { %v331_v45 = vadd.f32 1.0, %v794_v44 }
 0x776   :  { %795 = vrcp.f32 %v331_v45  ;;  %v343_v51 = vand.u32 2147483648, %v331_v45  ;;  %vm337_vm14 = vweird.f32 %v331_v45  ;;  %v341_v52 = vand.u32 2147483647, %v331_v45 }
 0x778   :  { %v344_v54 = vor.u32 1.1754944e-38, %v343_v51  ;;  %vm342_vm1 = vcmp.eq.f32.partialorder %v341_v52, 8.507059e+37 }
 0x77c   :  { %v796_v46 = vpop.eup %795 }
 0x77d   :  { %v333_v47 = vmul.f32 %v796_v46, %v331_v45  ;;  %vm338_vm13 = vweird.f32 %v796_v46 }
 0x77e   :  { %vm339_vm15 = vmor %vm337_vm14, %vm338_vm13 }
 0x77f   :  { %v334_v48 = vsub.f32 1.0, %v333_v47 }
 0x781   :  { %v335_v49 = vmul.f32 %v796_v46, %v334_v48 }
 0x783   :  { %v336_v50 = vadd.f32 %v796_v46, %v335_v49 }
 0x785   :  { %v340_v53 = vsel %vm339_vm15, %v796_v46, %v336_v50 }
 0x786   :  { %v345_v56 = vsel %vm342_vm1, %v344_v54, %v340_v53 }
 0x787   :  { %v348_v58 = vmul.f32 %v345_v56, %v293_v32  ;;  %v640_v32 = vld [vmem:[%s1096_s4 + $0x10] sm:$0xff] }
 0x788   :  { %759 = vmatpush.msra.mxu3 %v640_v32  ;;  %683 = vmatpush.msra.mxu1 %v640_v32 }
 0x78a   :  { %760 = vmatpush.msra.mxu3 %v639_v34  ;;  %684 = vmatpush.msra.mxu1 %v639_v34 }
 0x78c   :  { %761 = vmatpush.msra.mxu3 %v638_v35  ;;  %685 = vmatpush.msra.mxu1 %v638_v35 }
 0x7e4   :  { %v351_v55 = vpop.permute.xlu0 %350 }
 0x7e5   :  { %v353_v57 = vmul.f32 %v351_v55, %v345_v56 }
 0x7e7   :  { %355 = vrot.lane.b32.xlu1 %v353_v57, %s833_s3 }
 0x859   :  { %v356_v59 = vpop.permute.xlu1 %355 }
 0x85a   :  { %v358_v60 = vadd.f32 %v356_v59, %v348_v58 }
 0x85c   :  { %797 = vtanh.f32 %v358_v60 }
 0x862   :  { %v798_v61 = vpop.eup %797 }
 0x863   :  { %361 = vrot.lane.b32.xlu2 %v798_v61, %s832_s19 }
 0x8bd   :  { %v362_v62 = vpop.permute.xlu2 %361 }
 0x8be   :  { %v364_v63 = vmul.f32 %v362_v62, %v345_v56 }
 0x8c0   :  { %366 = vrot.lane.b32.xlu0 %v364_v63, %s833_s3 }
 0x932   :  { %v367_v1 = vpop.permute.xlu0 %366 }
 0x933   :  { %369 = vst.msk [vmem:[#allocation2 + $0x18] sm:$0xff] %vm39_vm0, %v367_v1  ;;  %738 = vmatmul.msk.f32.vlgmr.msrb.gmra.mxu2 %vm39_vm0, %v367_v1 }
 0x9b6   :  { %v389_v4 = vpop.f32.mrf.mxu2 }
 0x9b7   :  { %v392_v5 = vadd.f32 %v389_v4, %v94_v3  ;;  %v630_v4 = vld [vmem:[#allocation2] sm:$0xff] }
 0x9b9   :  { %799 = vtanh.f32 %v392_v5  ;;  %v739_v7 = vmul.f32 -1.442695, %v392_v5 }
 0x9bb   :  { %801 = vpow2.f32 %v739_v7  ;;  %v632_v7 = vld [vmem:[#allocation2 + $0x10] sm:$0xff] }
 0x9bf   :  { %v800_v6 = vpop.eup %799 }
 0x9c0   :  { %415 = vrot.lane.b32.xlu1 %v800_v6, %s832_s19  ;;  %v631_v6 = vld [vmem:[#allocation2 + $0x8] sm:$0xff] }
 0x9c1   :  { %v802_v8 = vpop.eup %801 }
 0x9c2   :  { %v396_v9 = vadd.f32 1.0, %v802_v8  ;;  %v633_v8 = vld [vmem:[#allocation2 + $0x18] sm:$0xff] }
 0x9c4   :  { %803 = vrcp.f32 %v396_v9  ;;  %v408_v18 = vand.u32 2147483648, %v396_v9  ;;  %vm402_vm3 = vweird.f32 %v396_v9  ;;  %v406_v19 = vand.u32 2147483647, %v396_v9 }
 0x9c6   :  { %v409_v21 = vor.u32 1.1754944e-38, %v408_v18  ;;  %vm407_vm5 = vcmp.eq.f32.partialorder %v406_v19, 8.507059e+37 }
 0x9ca   :  { %v804_v10 = vpop.eup %803 }
 0x9cb   :  { %v398_v11 = vmul.f32 %v804_v10, %v396_v9  ;;  %vm403_vm2 = vweird.f32 %v804_v10  ;;  %v100_v9 = vadd.f32 %v948_v15, %v941_v12 }
 0x9cc   :  { %vm404_vm4 = vmor %vm402_vm3, %vm403_vm2 }
 0x9cd   :  { %v399_v14 = vsub.f32 1.0, %v398_v11 }
 0x9cf   :  { %v400_v16 = vmul.f32 %v804_v10, %v399_v14 }
 0x9d1   :  { %v401_v17 = vadd.f32 %v804_v10, %v400_v16 }
 0x9d3   :  { %v405_v20 = vsel %vm404_vm4, %v804_v10, %v401_v17 }
 0x9d4   :  { %v410_v23 = vsel %vm407_vm5, %v409_v21, %v405_v20 }
 0x9d5   :  { %v413_v25 = vmul.f32 %v410_v23, %v358_v60 }
 0xa32   :  { %v416_v22 = vpop.permute.xlu1 %415 }
 0xa33   :  { %v418_v24 = vmul.f32 %v416_v22, %v410_v23 }
 0xa35   :  { %420 = vrot.lane.b32.xlu2 %v418_v24, %s833_s3 }
 0xa8f   :  { %v421_v26 = vpop.permute.xlu2 %420 }
 0xa90   :  { %v423_v27 = vadd.f32 %v421_v26, %v413_v25 }
 0xa92   :  { %805 = vtanh.f32 %v423_v27 }
 0xa98   :  { %v806_v28 = vpop.eup %805 }
 0xa99   :  { %426 = vrot.lane.b32.xlu0 %v806_v28, %s832_s19 }
 0xb0b   :  { %v427_v29 = vpop.permute.xlu0 %426 }
 0xb0c   :  { %v429_v30 = vmul.f32 %v427_v29, %v410_v23 }
 0xb0e   :  { %431 = vrot.lane.b32.xlu1 %v429_v30, %s833_s3 }
 0xb80   :  { %v432_v36 = vpop.permute.xlu1 %431 }
 0xb81   :  { %434 = vst.msk [vmem:[#allocation2 + $0x20] sm:$0xff] %vm39_vm0, %v432_v36  ;;  %740 = vmatmul.msk.f32.vlgmr.msrb.gmra.mxu3 %vm39_vm0, %v432_v36 }
 0xb88   :  { %v634_v37 = vld [vmem:[#allocation2 + $0x20] sm:$0xff] }
 0xb89   :  { %750 = vmatmul.msk.f32.vlgmr.msra.gmra.mxu3 %vm39_vm0, %v634_v37 }
 0xc04   :  { %v454_v40 = vpop.f32.mrf.mxu3 }
 0xc05   :  { %v457_v41 = vadd.f32 %v454_v40, %v97_v39 }
 0xc07   :  { %807 = vtanh.f32 %v457_v41  ;;  %v741_v46 = vmul.f32 -1.442695, %v457_v41 }
 0xc09   :  { %809 = vpow2.f32 %v741_v46 }
 0xc0c   :  { %v699_v43 = vpop.f32.mrf.mxu3 }
 0xc0d   :  { %v808_v44 = vpop.eup %807  ;;  %v700_v45 = vadd.f32 %v1026_v42, %v699_v43 }
 0xc0e   :  { %480 = vrot.lane.b32.xlu2 %v808_v44, %s832_s19 }
 0xc0f   :  { %715 = vst [vmem:[%s1098_s6 + $0x20] sm:$0xff] %v700_v45  ;;  %v810_v47 = vpop.eup %809 }
 0xc10   :  { %v461_v48 = vadd.f32 1.0, %v810_v47 }
 0xc12   :  { %811 = vrcp.f32 %v461_v48  ;;  %v473_v54 = vand.u32 2147483648, %v461_v48  ;;  %vm467_vm7 = vweird.f32 %v461_v48  ;;  %v471_v55 = vand.u32 2147483647, %v461_v48 }
 0xc14   :  { %v474_v57 = vor.u32 1.1754944e-38, %v473_v54  ;;  %vm472_vm9 = vcmp.eq.f32.partialorder %v471_v55, 8.507059e+37 }
 0xc18   :  { %v812_v49 = vpop.eup %811 }
 0xc19   :  { %v463_v50 = vmul.f32 %v812_v49, %v461_v48  ;;  %vm468_vm6 = vweird.f32 %v812_v49 }
 0xc1a   :  { %vm469_vm8 = vmor %vm467_vm7, %vm468_vm6 }
 0xc1b   :  { %v464_v51 = vsub.f32 1.0, %v463_v50 }
 0xc1d   :  { %v465_v52 = vmul.f32 %v812_v49, %v464_v51 }
 0xc1f   :  { %v466_v53 = vadd.f32 %v812_v49, %v465_v52 }
 0xc21   :  { %v470_v56 = vsel %vm469_vm8, %v812_v49, %v466_v53  ;;  %v103_v49 = vadd.f32 %v948_v15, %v943_v13 }
 0xc22   :  { %v475_v59 = vsel %vm472_vm9, %v474_v57, %v470_v56 }
 0xc23   :  { %v478_v61 = vmul.f32 %v475_v59, %v423_v27 }
 0xc68   :  { %v481_v58 = vpop.permute.xlu2 %480 }
 0xc69   :  { %v483_v60 = vmul.f32 %v481_v58, %v475_v59 }
 0xc6b   :  { %485 = vrot.lane.b32.xlu0 %v483_v60, %s833_s3 }
 0xcdd   :  { %v486_v62 = vpop.permute.xlu0 %485 }
 0xcde   :  { %v1034_v63 = vadd.f32 %v486_v62, %v478_v61 }
 0xce0   :  { %813 = vtanh.f32 %v1034_v63 }
 0xce6   :  { %v814_v0 = vpop.eup %813 }
 0xce7   :  { %491 = vrot.lane.b32.xlu1 %v814_v0, %s832_s19 }
 0xd59   :  { %v492_v1 = vpop.permute.xlu1 %491 }
 0xd5a   :  { %v494_v2 = vmul.f32 %v492_v1, %v475_v59 }
 0xd5c   :  { %496 = vrot.lane.b32.xlu2 %v494_v2, %s833_s3 }
 0xdb6   :  { %v497_v3 = vpop.permute.xlu2 %496 }
 0xdb7   :  { %499 = vst.msk [vmem:[#allocation2 + $0x28] sm:$0xff] %vm39_vm0, %v497_v3  ;;  %742 = vmatmul.msk.f32.vlgmr.msrb.gmra.mxu1 %vm39_vm0, %v497_v3 }
 0xdbe   :  { %v635_v5 = vld [vmem:[#allocation2 + $0x28] sm:$0xff] }
 0xdbf   :  { %746 = vmatmul.msk.f32.vlgmr.msra.gmra.mxu1 %vm39_vm0, %v630_v4  ;;  %751 = vmatmul.msk.f32.gmra.mxu3 %vm39_vm0, %v635_v5 }
 0xdc7   :  { %747 = vmatmul.msk.f32.gmra.mxu1 %vm39_vm0, %v631_v6 }
 0xdcf   :  { %748 = vmatmul.msk.f32.gmra.mxu1 %vm39_vm0, %v632_v7 }
 0xdd7   :  { %749 = vmatmul.msk.f32.gmra.mxu1 %vm39_vm0, %v633_v8 }
 0xe34   :  { %v519_v10 = vpop.f32.mrf.mxu1 }
 0xe35   :  { %v522_v11 = vadd.f32 %v519_v10, %v100_v9 }
 0xe37   :  { %815 = vtanh.f32 %v522_v11  ;;  %v743_v25 = vmul.f32 -1.442695, %v522_v11 }
 0xe39   :  { %817 = vpow2.f32 %v743_v25 }
 0xe3c   :  { %v687_v14 = vpop.f32.mrf.mxu1 }
 0xe3d   :  { %v816_v16 = vpop.eup %815  ;;  %v688_v17 = vadd.f32 %v1026_v42, %v687_v14 }
 0xe3e   :  { %545 = vrot.lane.b32.xlu0 %v816_v16, %s832_s19 }
 0xe3f   :  { %711 = vst [vmem:[%s1098_s6] sm:$0xff] %v688_v17  ;;  %v818_v26 = vpop.eup %817 }
 0xe40   :  { %v526_v27 = vadd.f32 1.0, %v818_v26 }
 0xe42   :  { %v702_v18 = vpop.f32.mrf.mxu3  ;;  %819 = vrcp.f32 %v526_v27  ;;  %v538_v33 = vand.u32 2147483648, %v526_v27  ;;  %vm532_vm11 = vweird.f32 %v526_v27  ;;  %v536_v34 = vand.u32 2147483647, %v526_v27 }
 0xe43   :  { %v703_v19 = vadd.f32 %v1026_v42, %v702_v18 }
 0xe44   :  { %v690_v20 = vpop.f32.mrf.mxu1  ;;  %v539_v36 = vor.u32 1.1754944e-38, %v538_v33  ;;  %vm537_vm13 = vcmp.eq.f32.partialorder %v536_v34, 8.507059e+37 }
 0xe45   :  { %716 = vst [vmem:[%s1098_s6 + $0x28] sm:$0xff] %v703_v19  ;;  %v691_v12 = vadd.f32 %v1026_v42, %v690_v20 }
 0xe47   :  { %712 = vst [vmem:[%s1098_s6 + $0x8] sm:$0xff] %v691_v12 }
 0xe48   :  { %v820_v28 = vpop.eup %819 }
 0xe49   :  { %v528_v29 = vmul.f32 %v820_v28, %v526_v27  ;;  %vm533_vm10 = vweird.f32 %v820_v28 }
 0xe4a   :  { %vm534_vm12 = vmor %vm532_vm11, %vm533_vm10 }
 0xe4b   :  { %v529_v30 = vsub.f32 1.0, %v528_v29 }
 0xe4c   :  { %v693_v21 = vpop.f32.mrf.mxu1 }
 0xe4d   :  { %v694_v22 = vadd.f32 %v1026_v42, %v693_v21  ;;  %v530_v31 = vmul.f32 %v820_v28, %v529_v30 }
 0xe4f   :  { %713 = vst [vmem:[%s1098_s6 + $0x10] sm:$0xff] %v694_v22  ;;  %v531_v32 = vadd.f32 %v820_v28, %v530_v31 }
 0xe51   :  { %v535_v35 = vsel %vm534_vm12, %v820_v28, %v531_v32 }
 0xe52   :  { %v540_v38 = vsel %vm537_vm13, %v539_v36, %v535_v35 }
 0xe53   :  { %v543_v40 = vmul.f32 %v540_v38, %v1034_v63 }
 0xe54   :  { %v696_v23 = vpop.f32.mrf.mxu1 }
 0xe55   :  { %v697_v24 = vadd.f32 %v1026_v42, %v696_v23 }
 0xe57   :  { %714 = vst [vmem:[%s1098_s6 + $0x18] sm:$0xff] %v697_v24 }
 0xeb0   :  { %v546_v37 = vpop.permute.xlu0 %545 }
 0xeb1   :  { %v548_v39 = vmul.f32 %v546_v37, %v540_v38 }
 0xeb3   :  { %550 = vrot.lane.b32.xlu1 %v548_v39, %s833_s3 }
 0xf25   :  { %v551_v41 = vpop.permute.xlu1 %550 }
 0xf26   :  { %v553_v43 = vadd.f32 %v551_v41, %v543_v40 }
 0xf28   :  { %821 = vtanh.f32 %v553_v43 }
 0xf2e   :  { %v822_v44 = vpop.eup %821 }
 0xf2f   :  { %556 = vrot.lane.b32.xlu2 %v822_v44, %s832_s19 }
 0xf89   :  { %v557_v45 = vpop.permute.xlu2 %556 }
 0xf8a   :  { %v559_v46 = vmul.f32 %v557_v45, %v540_v38 }
 0xf8c   :  { %561 = vrot.lane.b32.xlu0 %v559_v46, %s833_s3 }
 0xffe   :  { %v562_v47 = vpop.permute.xlu0 %561 }
 0xfff   :  { %564 = vst.msk [vmem:[#allocation2 + $0x30] sm:$0xff] %vm39_vm0, %v562_v47  ;;  %744 = vmatmul.msk.f32.vlgmr.msra.gmra.mxu2 %vm39_vm0, %v562_v47 }
0x1006   :  { %v636_v48 = vld [vmem:[#allocation2 + $0x30] sm:$0xff] }
0x1007   :  { %752 = vmatmul.msk.f32.gmra.mxu3 %vm39_vm0, %v636_v48 }
0x1082   :  { %v584_v50 = vpop.f32.mrf.mxu2 }
0x1083   :  { %v587_v51 = vadd.f32 %v584_v50, %v103_v49 }
0x1085   :  { %823 = vtanh.f32 %v587_v51  ;;  %v745_v55 = vmul.f32 -1.442695, %v587_v51 }
0x1087   :  { %825 = vpow2.f32 %v745_v55 }
0x108a   :  { %v705_v52 = vpop.f32.mrf.mxu3 }
0x108b   :  { %v824_v53 = vpop.eup %823  ;;  %v706_v54 = vadd.f32 %v1026_v42, %v705_v52 }
0x108c   :  { %610 = vrot.lane.b32.xlu1 %v824_v53, %s832_s19 }
0x108d   :  { %717 = vst [vmem:[%s1098_s6 + $0x30] sm:$0xff] %v706_v54  ;;  %v826_v56 = vpop.eup %825 }
0x108e   :  { %v591_v57 = vadd.f32 1.0, %v826_v56 }
0x1090   :  { %827 = vrcp.f32 %v591_v57  ;;  %v603_v61 = vand.u32 2147483648, %v591_v57  ;;  %vm597_vm15 = vweird.f32 %v591_v57  ;;  %v601_v62 = vand.u32 2147483647, %v591_v57 }
0x1092   :  { %v604_v0 = vor.u32 1.1754944e-38, %v603_v61  ;;  %vm602_vm2 = vcmp.eq.f32.partialorder %v601_v62, 8.507059e+37 }
0x1096   :  { %v828_v58 = vpop.eup %827 }
0x1097   :  { %v593_v13 = vmul.f32 %v828_v58, %v591_v57  ;;  %vm598_vm14 = vweird.f32 %v828_v58 }
0x1098   :  { %vm599_vm1 = vmor %vm597_vm15, %vm598_vm14 }
0x1099   :  { %v594_v15 = vsub.f32 1.0, %v593_v13 }
0x109b   :  { %v595_v59 = vmul.f32 %v828_v58, %v594_v15 }
0x109d   :  { %v596_v60 = vadd.f32 %v828_v58, %v595_v59 }
0x109f   :  { %v600_v63 = vsel %vm599_vm1, %v828_v58, %v596_v60 }
0x10a0   :  { %v605_v2 = vsel %vm602_vm2, %v604_v0, %v600_v63 }
0x10a1   :  { %v608_v4 = vmul.f32 %v605_v2, %v553_v43 }
0x10fe   :  { %v611_v1 = vpop.permute.xlu1 %610 }
0x10ff   :  { %v613_v3 = vmul.f32 %v611_v1, %v605_v2 }
0x1101   :  { %615 = vrot.lane.b32.xlu2 %v613_v3, %s833_s3 }
0x115b   :  { %v616_v5 = vpop.permute.xlu2 %615 }
0x115c   :  { %v618_v6 = vadd.f32 %v616_v5, %v608_v4 }
0x115e   :  { %829 = vtanh.f32 %v618_v6 }
0x1164   :  { %v830_v7 = vpop.eup %829 }
0x1165   :  { %621 = vrot.lane.b32.xlu0 %v830_v7, %s832_s19 }
0x11d7   :  { %v622_v8 = vpop.permute.xlu0 %621 }
0x11d8   :  { %v624_v9 = vmul.f32 %v622_v8, %v605_v2 }
0x11da   :  { %626 = vrot.lane.b32.xlu1 %v624_v9, %s833_s3 }
0x124c   :  { %v627_v10 = vpop.permute.xlu1 %626 }
0x124d   :  { %629 = vst.msk [vmem:[#allocation2 + $0x38] sm:$0xff] %vm39_vm0, %v627_v10 }
0x1254   :  { %v637_v11 = vld [vmem:[#allocation2 + $0x38] sm:$0xff] }
0x1255   :  { %753 = vmatmul.msk.f32.gmra.mxu3 %vm39_vm0, %v637_v11 }
0x12d8   :  { %v708_v14 = vpop.f32.mrf.mxu3 }
0x12d9   :  { %v709_v16 = vadd.f32 %v1026_v42, %v708_v14 }
0x12db   :  { %718 = vst [vmem:[%s1098_s6 + $0x38] sm:$0xff] %v709_v16 }

</bundles_post_ra>
